<compile_context>
chip_gen: v6e
topology: v6e:2x2x1
jax: 0.10.0
libtpu: 0.0.40
codegen_flags: <defaults>
</compile_context>

<pallas_src>
import jax
import jax.numpy as jnp
from jax.experimental import pallas as pl
from jax.experimental.pallas import tpu as pltpu


def _round_up(n, m):
    return (n + m - 1) // m * m


def center_loss_kernel(lbl_ref, x_ref, c_hbm, o_ref, cbuf, sem):
    """One grid step handles TB batch rows.

    lbl_ref : (B_pad,) int32 in SMEM (scalar prefetch)
    x_ref   : (TB, D) f32 VMEM tile of features (auto-pipelined)
    c_hbm   : (C, D)  f32 raw HBM ref (memory_space=pl.ANY, no auto-DMA)
    o_ref   : (TB, 1) f32 per-row clamped squared distances
    cbuf    : (TB, D) f32 VMEM scratch for the gathered center rows
    sem     : (TB,)   DMA semaphores
    """
    t = pl.program_id(0)
    tb = x_ref.shape[0]

    # Gather c_{labels[i]} for the TB rows of this tile: one row DMA each,
    # issued back-to-back and then waited on (only B rows of centers are read).
    copies = []
    for r in range(tb):
        idx = lbl_ref[t * tb + r]
        cp = pltpu.make_async_copy(
            c_hbm.at[pl.ds(idx, 1), :],
            cbuf.at[pl.ds(r, 1), :],
            sem.at[r],
        )
        cp.start()
        copies.append(cp)
    for cp in copies:
        cp.wait()

    xs = x_ref[...]            # (TB, D)
    cs = cbuf[...]             # (TB, D)

    # Expanded form ||x||^2 + ||c||^2 - 2<x, c> for exact parity with the
    # PyTorch reference (do NOT rewrite as ||x - c||^2).
    x2 = jnp.sum(xs * xs, axis=1, keepdims=True)   # (TB, 1)
    c2 = jnp.sum(cs * cs, axis=1, keepdims=True)   # (TB, 1)
    xc = jnp.sum(xs * cs, axis=1, keepdims=True)   # (TB, 1)
    d = x2 + c2 - 2.0 * xc
    o_ref[...] = jnp.clip(d, 1e-12, 1e12)


def center_loss(x, centers, labels, *, block_b=128):
    """x: (B, D) f32, centers: (C, D) f32, labels: (B,) int -> scalar f32."""
    B, D = x.shape
    C, Dc = centers.shape
    assert D == Dc
    x = x.astype(jnp.float32)
    centers = centers.astype(jnp.float32)
    labels = labels.astype(jnp.int32)

    # Batch tile: multiple of 8 sublanes, capped at block_b.
    tb = min(block_b, _round_up(B, 8))
    b_pad = _round_up(B, tb)
    if b_pad != B:
        x = jnp.pad(x, ((0, b_pad - B), (0, 0)))
        labels = jnp.pad(labels, (0, b_pad - B))   # pad with valid class 0
    num_tiles = b_pad // tb

    per_row = pl.pallas_call(
        center_loss_kernel,
        out_shape=jax.ShapeDtypeStruct((b_pad, 1), jnp.float32),
        grid_spec=pltpu.PrefetchScalarGridSpec(
            num_scalar_prefetch=1,               # labels -> SMEM
            grid=(num_tiles,),
            in_specs=[
                pl.BlockSpec((tb, D), lambda t, lbl: (t, 0)),   # x tile
                pl.BlockSpec(memory_space=pl.ANY),              # centers in HBM
            ],
            out_specs=pl.BlockSpec((tb, 1), lambda t, lbl: (t, 0)),
            scratch_shapes=[
                pltpu.VMEM((tb, D), jnp.float32),
                pltpu.SemaphoreType.DMA((tb,)),
            ],
        ),
        compiler_params=pltpu.CompilerParams(
            dimension_semantics=("parallel",),    # batch tiles are independent
        ),
    )(labels, x, centers)

    # Final tiny reduction (B values) done outside the kernel; padded rows
    # (if any) are sliced off so they never affect the mean.
    return jnp.sum(per_row[:B, 0]) / jnp.float32(B)


def center_loss_ref(x, centers, labels):
    # Pure-JAX reference with identical semantics to the PyTorch module.
    x = x.astype(jnp.float32)
    centers = centers.astype(jnp.float32)
    B = x.shape[0]
    C = centers.shape[0]
    distmat = (
        jnp.sum(x**2, axis=1, keepdims=True)
        + jnp.sum(centers**2, axis=1, keepdims=True).T
        - 2.0 * x @ centers.T
    )
    mask = labels[:, None] == jnp.arange(C)[None, :]
    dist = jnp.clip(distmat, 1e-12, 1e12)
    return jnp.sum(jnp.where(mask, dist, 0.0)) / B


if __name__ == "__main__":
    # Small synthetic shapes consistent with the module's forward.
    num_classes = 32
    feat_dim = 64
    batch = 8

    key = jax.random.PRNGKey(0)
    kx, kc, kl = jax.random.split(key, 3)

    x = jax.random.normal(kx, (batch, feat_dim), dtype=jnp.float32)
    # Deterministic "parameter" init mirroring torch.randn(num_classes, feat_dim).
    centers = jax.random.normal(kc, (num_classes, feat_dim), dtype=jnp.float32)
    labels = jax.random.randint(kl, (batch,), 0, num_classes, dtype=jnp.int32)

    loss = jax.block_until_ready(center_loss(x, centers, labels))
    loss_ref = jax.block_until_ready(center_loss_ref(x, centers, labels))

    assert jnp.allclose(loss, loss_ref, rtol=1e-5, atol=1e-5), (loss, loss_ref)
    print("KERNEL_OK")
</pallas_src>

<mosaic_0001>
module attributes {stable_mosaic.version = 11 : i64} {
  func.func @center_loss_kernel(%arg0: i32, %arg1: memref<8xi32, #tpu.memory_space<smem>>, %arg2: memref<8x64xf32, #tpu.memory_space<vmem>>, %arg3: memref<32x64xf32, #tpu.memory_space<any>>, %arg4: memref<8x1xf32, #tpu.memory_space<vmem>>, %arg5: memref<8x64xf32, #tpu.memory_space<vmem>>, %arg6: memref<8x!tpu.dma_semaphore, #tpu.memory_space<semaphore_mem>>) attributes {dimension_semantics = [#tpu.dimension_semantics<parallel>], iteration_bounds = array<i64: 1>, scalar_prefetch = 1 : i64, scratch_operands = 2 : i64, tpu.core_type = #tpu.core_type<tc>, window_params = [{transform_indices = @transform_0, window_bounds = array<i64: 8, 64>}, {}, {transform_indices = @transform_2, window_bounds = array<i64: 8, 1>}]} {
    %c8_i32 = arith.constant 8 : i32
    %0 = arith.muli %arg0, %c8_i32 : i32
    %c0_i32 = arith.constant 0 : i32
    %1 = arith.addi %0, %c0_i32 : i32
    %2 = arith.index_cast %1 : i32 to index
    %3 = memref.load %arg1[%2] : memref<8xi32, #tpu.memory_space<smem>>
    %c0_i32_0 = arith.constant 0 : i32
    %c0_i32_1 = arith.constant 0 : i32
    %4 = tpu.memref_slice %arg3[%3, %c0_i32_1] : memref<32x64xf32, #tpu.memory_space<any>> -> memref<1x64xf32, #tpu.memory_space<any>>
    %c0_i32_2 = arith.constant 0 : i32
    %c0_i32_3 = arith.constant 0 : i32
    %5 = tpu.memref_slice %arg5[%c0_i32_2, %c0_i32_3] : memref<8x64xf32, #tpu.memory_space<vmem>> -> memref<1x64xf32, #tpu.memory_space<vmem>>
    %6 = tpu.memref_slice %arg6[%c0_i32_0] : memref<8x!tpu.dma_semaphore, #tpu.memory_space<semaphore_mem>> -> memref<1x!tpu.dma_semaphore, #tpu.memory_space<semaphore_mem>>
    %7 = tpu.memref_squeeze %6 : memref<1x!tpu.dma_semaphore, #tpu.memory_space<semaphore_mem>> -> memref<!tpu.dma_semaphore, #tpu.memory_space<semaphore_mem>>
    tpu.enqueue_dma source(%4 : memref<1x64xf32, #tpu.memory_space<any>>) target(%5 : memref<1x64xf32, #tpu.memory_space<vmem>>) target_semaphore(%7 : memref<!tpu.dma_semaphore, #tpu.memory_space<semaphore_mem>>)
    %c8_i32_4 = arith.constant 8 : i32
    %8 = arith.muli %arg0, %c8_i32_4 : i32
    %c1_i32 = arith.constant 1 : i32
    %9 = arith.addi %8, %c1_i32 : i32
    %10 = arith.index_cast %9 : i32 to index
    %11 = memref.load %arg1[%10] : memref<8xi32, #tpu.memory_space<smem>>
    %c1_i32_5 = arith.constant 1 : i32
    %c0_i32_6 = arith.constant 0 : i32
    %12 = tpu.memref_slice %arg3[%11, %c0_i32_6] : memref<32x64xf32, #tpu.memory_space<any>> -> memref<1x64xf32, #tpu.memory_space<any>>
    %c1_i32_7 = arith.constant 1 : i32
    %c0_i32_8 = arith.constant 0 : i32
    %13 = tpu.memref_slice %arg5[%c1_i32_7, %c0_i32_8] : memref<8x64xf32, #tpu.memory_space<vmem>> -> memref<1x64xf32, #tpu.memory_space<vmem>>
    %14 = tpu.memref_slice %arg6[%c1_i32_5] : memref<8x!tpu.dma_semaphore, #tpu.memory_space<semaphore_mem>> -> memref<1x!tpu.dma_semaphore, #tpu.memory_space<semaphore_mem>>
    %15 = tpu.memref_squeeze %14 : memref<1x!tpu.dma_semaphore, #tpu.memory_space<semaphore_mem>> -> memref<!tpu.dma_semaphore, #tpu.memory_space<semaphore_mem>>
    tpu.enqueue_dma source(%12 : memref<1x64xf32, #tpu.memory_space<any>>) target(%13 : memref<1x64xf32, #tpu.memory_space<vmem>>) target_semaphore(%15 : memref<!tpu.dma_semaphore, #tpu.memory_space<semaphore_mem>>)
    %c8_i32_9 = arith.constant 8 : i32
    %16 = arith.muli %arg0, %c8_i32_9 : i32
    %c2_i32 = arith.constant 2 : i32
    %17 = arith.addi %16, %c2_i32 : i32
    %18 = arith.index_cast %17 : i32 to index
    %19 = memref.load %arg1[%18] : memref<8xi32, #tpu.memory_space<smem>>
    %c2_i32_10 = arith.constant 2 : i32
    %c0_i32_11 = arith.constant 0 : i32
    %20 = tpu.memref_slice %arg3[%19, %c0_i32_11] : memref<32x64xf32, #tpu.memory_space<any>> -> memref<1x64xf32, #tpu.memory_space<any>>
    %c2_i32_12 = arith.constant 2 : i32
    %c0_i32_13 = arith.constant 0 : i32
    %21 = tpu.memref_slice %arg5[%c2_i32_12, %c0_i32_13] : memref<8x64xf32, #tpu.memory_space<vmem>> -> memref<1x64xf32, #tpu.memory_space<vmem>>
    %22 = tpu.memref_slice %arg6[%c2_i32_10] : memref<8x!tpu.dma_semaphore, #tpu.memory_space<semaphore_mem>> -> memref<1x!tpu.dma_semaphore, #tpu.memory_space<semaphore_mem>>
    %23 = tpu.memref_squeeze %22 : memref<1x!tpu.dma_semaphore, #tpu.memory_space<semaphore_mem>> -> memref<!tpu.dma_semaphore, #tpu.memory_space<semaphore_mem>>
    tpu.enqueue_dma source(%20 : memref<1x64xf32, #tpu.memory_space<any>>) target(%21 : memref<1x64xf32, #tpu.memory_space<vmem>>) target_semaphore(%23 : memref<!tpu.dma_semaphore, #tpu.memory_space<semaphore_mem>>)
    %c8_i32_14 = arith.constant 8 : i32
    %24 = arith.muli %arg0, %c8_i32_14 : i32
    %c3_i32 = arith.constant 3 : i32
    %25 = arith.addi %24, %c3_i32 : i32
    %26 = arith.index_cast %25 : i32 to index
    %27 = memref.load %arg1[%26] : memref<8xi32, #tpu.memory_space<smem>>
    %c3_i32_15 = arith.constant 3 : i32
    %c0_i32_16 = arith.constant 0 : i32
    %28 = tpu.memref_slice %arg3[%27, %c0_i32_16] : memref<32x64xf32, #tpu.memory_space<any>> -> memref<1x64xf32, #tpu.memory_space<any>>
    %c3_i32_17 = arith.constant 3 : i32
    %c0_i32_18 = arith.constant 0 : i32
    %29 = tpu.memref_slice %arg5[%c3_i32_17, %c0_i32_18] : memref<8x64xf32, #tpu.memory_space<vmem>> -> memref<1x64xf32, #tpu.memory_space<vmem>>
    %30 = tpu.memref_slice %arg6[%c3_i32_15] : memref<8x!tpu.dma_semaphore, #tpu.memory_space<semaphore_mem>> -> memref<1x!tpu.dma_semaphore, #tpu.memory_space<semaphore_mem>>
    %31 = tpu.memref_squeeze %30 : memref<1x!tpu.dma_semaphore, #tpu.memory_space<semaphore_mem>> -> memref<!tpu.dma_semaphore, #tpu.memory_space<semaphore_mem>>
    tpu.enqueue_dma source(%28 : memref<1x64xf32, #tpu.memory_space<any>>) target(%29 : memref<1x64xf32, #tpu.memory_space<vmem>>) target_semaphore(%31 : memref<!tpu.dma_semaphore, #tpu.memory_space<semaphore_mem>>)
    %c8_i32_19 = arith.constant 8 : i32
    %32 = arith.muli %arg0, %c8_i32_19 : i32
    %c4_i32 = arith.constant 4 : i32
    %33 = arith.addi %32, %c4_i32 : i32
    %34 = arith.index_cast %33 : i32 to index
    %35 = memref.load %arg1[%34] : memref<8xi32, #tpu.memory_space<smem>>
    %c4_i32_20 = arith.constant 4 : i32
    %c0_i32_21 = arith.constant 0 : i32
    %36 = tpu.memref_slice %arg3[%35, %c0_i32_21] : memref<32x64xf32, #tpu.memory_space<any>> -> memref<1x64xf32, #tpu.memory_space<any>>
    %c4_i32_22 = arith.constant 4 : i32
    %c0_i32_23 = arith.constant 0 : i32
    %37 = tpu.memref_slice %arg5[%c4_i32_22, %c0_i32_23] : memref<8x64xf32, #tpu.memory_space<vmem>> -> memref<1x64xf32, #tpu.memory_space<vmem>>
    %38 = tpu.memref_slice %arg6[%c4_i32_20] : memref<8x!tpu.dma_semaphore, #tpu.memory_space<semaphore_mem>> -> memref<1x!tpu.dma_semaphore, #tpu.memory_space<semaphore_mem>>
    %39 = tpu.memref_squeeze %38 : memref<1x!tpu.dma_semaphore, #tpu.memory_space<semaphore_mem>> -> memref<!tpu.dma_semaphore, #tpu.memory_space<semaphore_mem>>
    tpu.enqueue_dma source(%36 : memref<1x64xf32, #tpu.memory_space<any>>) target(%37 : memref<1x64xf32, #tpu.memory_space<vmem>>) target_semaphore(%39 : memref<!tpu.dma_semaphore, #tpu.memory_space<semaphore_mem>>)
    %c8_i32_24 = arith.constant 8 : i32
    %40 = arith.muli %arg0, %c8_i32_24 : i32
    %c5_i32 = arith.constant 5 : i32
    %41 = arith.addi %40, %c5_i32 : i32
    %42 = arith.index_cast %41 : i32 to index
    %43 = memref.load %arg1[%42] : memref<8xi32, #tpu.memory_space<smem>>
    %c5_i32_25 = arith.constant 5 : i32
    %c0_i32_26 = arith.constant 0 : i32
    %44 = tpu.memref_slice %arg3[%43, %c0_i32_26] : memref<32x64xf32, #tpu.memory_space<any>> -> memref<1x64xf32, #tpu.memory_space<any>>
    %c5_i32_27 = arith.constant 5 : i32
    %c0_i32_28 = arith.constant 0 : i32
    %45 = tpu.memref_slice %arg5[%c5_i32_27, %c0_i32_28] : memref<8x64xf32, #tpu.memory_space<vmem>> -> memref<1x64xf32, #tpu.memory_space<vmem>>
    %46 = tpu.memref_slice %arg6[%c5_i32_25] : memref<8x!tpu.dma_semaphore, #tpu.memory_space<semaphore_mem>> -> memref<1x!tpu.dma_semaphore, #tpu.memory_space<semaphore_mem>>
    %47 = tpu.memref_squeeze %46 : memref<1x!tpu.dma_semaphore, #tpu.memory_space<semaphore_mem>> -> memref<!tpu.dma_semaphore, #tpu.memory_space<semaphore_mem>>
    tpu.enqueue_dma source(%44 : memref<1x64xf32, #tpu.memory_space<any>>) target(%45 : memref<1x64xf32, #tpu.memory_space<vmem>>) target_semaphore(%47 : memref<!tpu.dma_semaphore, #tpu.memory_space<semaphore_mem>>)
    %c8_i32_29 = arith.constant 8 : i32
    %48 = arith.muli %arg0, %c8_i32_29 : i32
    %c6_i32 = arith.constant 6 : i32
    %49 = arith.addi %48, %c6_i32 : i32
    %50 = arith.index_cast %49 : i32 to index
    %51 = memref.load %arg1[%50] : memref<8xi32, #tpu.memory_space<smem>>
    %c6_i32_30 = arith.constant 6 : i32
    %c0_i32_31 = arith.constant 0 : i32
    %52 = tpu.memref_slice %arg3[%51, %c0_i32_31] : memref<32x64xf32, #tpu.memory_space<any>> -> memref<1x64xf32, #tpu.memory_space<any>>
    %c6_i32_32 = arith.constant 6 : i32
    %c0_i32_33 = arith.constant 0 : i32
    %53 = tpu.memref_slice %arg5[%c6_i32_32, %c0_i32_33] : memref<8x64xf32, #tpu.memory_space<vmem>> -> memref<1x64xf32, #tpu.memory_space<vmem>>
    %54 = tpu.memref_slice %arg6[%c6_i32_30] : memref<8x!tpu.dma_semaphore, #tpu.memory_space<semaphore_mem>> -> memref<1x!tpu.dma_semaphore, #tpu.memory_space<semaphore_mem>>
    %55 = tpu.memref_squeeze %54 : memref<1x!tpu.dma_semaphore, #tpu.memory_space<semaphore_mem>> -> memref<!tpu.dma_semaphore, #tpu.memory_space<semaphore_mem>>
    tpu.enqueue_dma source(%52 : memref<1x64xf32, #tpu.memory_space<any>>) target(%53 : memref<1x64xf32, #tpu.memory_space<vmem>>) target_semaphore(%55 : memref<!tpu.dma_semaphore, #tpu.memory_space<semaphore_mem>>)
    %c8_i32_34 = arith.constant 8 : i32
    %56 = arith.muli %arg0, %c8_i32_34 : i32
    %c7_i32 = arith.constant 7 : i32
    %57 = arith.addi %56, %c7_i32 : i32
    %58 = arith.index_cast %57 : i32 to index
    %59 = memref.load %arg1[%58] : memref<8xi32, #tpu.memory_space<smem>>
    %c7_i32_35 = arith.constant 7 : i32
    %c0_i32_36 = arith.constant 0 : i32
    %60 = tpu.memref_slice %arg3[%59, %c0_i32_36] : memref<32x64xf32, #tpu.memory_space<any>> -> memref<1x64xf32, #tpu.memory_space<any>>
    %c7_i32_37 = arith.constant 7 : i32
    %c0_i32_38 = arith.constant 0 : i32
    %61 = tpu.memref_slice %arg5[%c7_i32_37, %c0_i32_38] : memref<8x64xf32, #tpu.memory_space<vmem>> -> memref<1x64xf32, #tpu.memory_space<vmem>>
    %62 = tpu.memref_slice %arg6[%c7_i32_35] : memref<8x!tpu.dma_semaphore, #tpu.memory_space<semaphore_mem>> -> memref<1x!tpu.dma_semaphore, #tpu.memory_space<semaphore_mem>>
    %63 = tpu.memref_squeeze %62 : memref<1x!tpu.dma_semaphore, #tpu.memory_space<semaphore_mem>> -> memref<!tpu.dma_semaphore, #tpu.memory_space<semaphore_mem>>
    tpu.enqueue_dma source(%60 : memref<1x64xf32, #tpu.memory_space<any>>) target(%61 : memref<1x64xf32, #tpu.memory_space<vmem>>) target_semaphore(%63 : memref<!tpu.dma_semaphore, #tpu.memory_space<semaphore_mem>>)
    %c0_i32_39 = arith.constant 0 : i32
    %c0_i32_40 = arith.constant 0 : i32
    %64 = tpu.memref_slice %arg3[%3, %c0_i32_40] : memref<32x64xf32, #tpu.memory_space<any>> -> memref<1x64xf32, #tpu.memory_space<any>>
    %c0_i32_41 = arith.constant 0 : i32
    %c0_i32_42 = arith.constant 0 : i32
    %65 = tpu.memref_slice %arg5[%c0_i32_41, %c0_i32_42] : memref<8x64xf32, #tpu.memory_space<vmem>> -> memref<1x64xf32, #tpu.memory_space<vmem>>
    %66 = tpu.memref_slice %arg6[%c0_i32_39] : memref<8x!tpu.dma_semaphore, #tpu.memory_space<semaphore_mem>> -> memref<1x!tpu.dma_semaphore, #tpu.memory_space<semaphore_mem>>
    %67 = tpu.memref_squeeze %66 : memref<1x!tpu.dma_semaphore, #tpu.memory_space<semaphore_mem>> -> memref<!tpu.dma_semaphore, #tpu.memory_space<semaphore_mem>>
    tpu.wait_dma2 semaphore(%67 : memref<!tpu.dma_semaphore, #tpu.memory_space<semaphore_mem>>) src(%64 : memref<1x64xf32, #tpu.memory_space<any>>) dst(%65 : memref<1x64xf32, #tpu.memory_space<vmem>>)
    %c1_i32_43 = arith.constant 1 : i32
    %c0_i32_44 = arith.constant 0 : i32
    %68 = tpu.memref_slice %arg3[%11, %c0_i32_44] : memref<32x64xf32, #tpu.memory_space<any>> -> memref<1x64xf32, #tpu.memory_space<any>>
    %c1_i32_45 = arith.constant 1 : i32
    %c0_i32_46 = arith.constant 0 : i32
    %69 = tpu.memref_slice %arg5[%c1_i32_45, %c0_i32_46] : memref<8x64xf32, #tpu.memory_space<vmem>> -> memref<1x64xf32, #tpu.memory_space<vmem>>
    %70 = tpu.memref_slice %arg6[%c1_i32_43] : memref<8x!tpu.dma_semaphore, #tpu.memory_space<semaphore_mem>> -> memref<1x!tpu.dma_semaphore, #tpu.memory_space<semaphore_mem>>
    %71 = tpu.memref_squeeze %70 : memref<1x!tpu.dma_semaphore, #tpu.memory_space<semaphore_mem>> -> memref<!tpu.dma_semaphore, #tpu.memory_space<semaphore_mem>>
    tpu.wait_dma2 semaphore(%71 : memref<!tpu.dma_semaphore, #tpu.memory_space<semaphore_mem>>) src(%68 : memref<1x64xf32, #tpu.memory_space<any>>) dst(%69 : memref<1x64xf32, #tpu.memory_space<vmem>>)
    %c2_i32_47 = arith.constant 2 : i32
    %c0_i32_48 = arith.constant 0 : i32
    %72 = tpu.memref_slice %arg3[%19, %c0_i32_48] : memref<32x64xf32, #tpu.memory_space<any>> -> memref<1x64xf32, #tpu.memory_space<any>>
    %c2_i32_49 = arith.constant 2 : i32
    %c0_i32_50 = arith.constant 0 : i32
    %73 = tpu.memref_slice %arg5[%c2_i32_49, %c0_i32_50] : memref<8x64xf32, #tpu.memory_space<vmem>> -> memref<1x64xf32, #tpu.memory_space<vmem>>
    %74 = tpu.memref_slice %arg6[%c2_i32_47] : memref<8x!tpu.dma_semaphore, #tpu.memory_space<semaphore_mem>> -> memref<1x!tpu.dma_semaphore, #tpu.memory_space<semaphore_mem>>
    %75 = tpu.memref_squeeze %74 : memref<1x!tpu.dma_semaphore, #tpu.memory_space<semaphore_mem>> -> memref<!tpu.dma_semaphore, #tpu.memory_space<semaphore_mem>>
    tpu.wait_dma2 semaphore(%75 : memref<!tpu.dma_semaphore, #tpu.memory_space<semaphore_mem>>) src(%72 : memref<1x64xf32, #tpu.memory_space<any>>) dst(%73 : memref<1x64xf32, #tpu.memory_space<vmem>>)
    %c3_i32_51 = arith.constant 3 : i32
    %c0_i32_52 = arith.constant 0 : i32
    %76 = tpu.memref_slice %arg3[%27, %c0_i32_52] : memref<32x64xf32, #tpu.memory_space<any>> -> memref<1x64xf32, #tpu.memory_space<any>>
    %c3_i32_53 = arith.constant 3 : i32
    %c0_i32_54 = arith.constant 0 : i32
    %77 = tpu.memref_slice %arg5[%c3_i32_53, %c0_i32_54] : memref<8x64xf32, #tpu.memory_space<vmem>> -> memref<1x64xf32, #tpu.memory_space<vmem>>
    %78 = tpu.memref_slice %arg6[%c3_i32_51] : memref<8x!tpu.dma_semaphore, #tpu.memory_space<semaphore_mem>> -> memref<1x!tpu.dma_semaphore, #tpu.memory_space<semaphore_mem>>
    %79 = tpu.memref_squeeze %78 : memref<1x!tpu.dma_semaphore, #tpu.memory_space<semaphore_mem>> -> memref<!tpu.dma_semaphore, #tpu.memory_space<semaphore_mem>>
    tpu.wait_dma2 semaphore(%79 : memref<!tpu.dma_semaphore, #tpu.memory_space<semaphore_mem>>) src(%76 : memref<1x64xf32, #tpu.memory_space<any>>) dst(%77 : memref<1x64xf32, #tpu.memory_space<vmem>>)
    %c4_i32_55 = arith.constant 4 : i32
    %c0_i32_56 = arith.constant 0 : i32
    %80 = tpu.memref_slice %arg3[%35, %c0_i32_56] : memref<32x64xf32, #tpu.memory_space<any>> -> memref<1x64xf32, #tpu.memory_space<any>>
    %c4_i32_57 = arith.constant 4 : i32
    %c0_i32_58 = arith.constant 0 : i32
    %81 = tpu.memref_slice %arg5[%c4_i32_57, %c0_i32_58] : memref<8x64xf32, #tpu.memory_space<vmem>> -> memref<1x64xf32, #tpu.memory_space<vmem>>
    %82 = tpu.memref_slice %arg6[%c4_i32_55] : memref<8x!tpu.dma_semaphore, #tpu.memory_space<semaphore_mem>> -> memref<1x!tpu.dma_semaphore, #tpu.memory_space<semaphore_mem>>
    %83 = tpu.memref_squeeze %82 : memref<1x!tpu.dma_semaphore, #tpu.memory_space<semaphore_mem>> -> memref<!tpu.dma_semaphore, #tpu.memory_space<semaphore_mem>>
    tpu.wait_dma2 semaphore(%83 : memref<!tpu.dma_semaphore, #tpu.memory_space<semaphore_mem>>) src(%80 : memref<1x64xf32, #tpu.memory_space<any>>) dst(%81 : memref<1x64xf32, #tpu.memory_space<vmem>>)
    %c5_i32_59 = arith.constant 5 : i32
    %c0_i32_60 = arith.constant 0 : i32
    %84 = tpu.memref_slice %arg3[%43, %c0_i32_60] : memref<32x64xf32, #tpu.memory_space<any>> -> memref<1x64xf32, #tpu.memory_space<any>>
    %c5_i32_61 = arith.constant 5 : i32
    %c0_i32_62 = arith.constant 0 : i32
    %85 = tpu.memref_slice %arg5[%c5_i32_61, %c0_i32_62] : memref<8x64xf32, #tpu.memory_space<vmem>> -> memref<1x64xf32, #tpu.memory_space<vmem>>
    %86 = tpu.memref_slice %arg6[%c5_i32_59] : memref<8x!tpu.dma_semaphore, #tpu.memory_space<semaphore_mem>> -> memref<1x!tpu.dma_semaphore, #tpu.memory_space<semaphore_mem>>
    %87 = tpu.memref_squeeze %86 : memref<1x!tpu.dma_semaphore, #tpu.memory_space<semaphore_mem>> -> memref<!tpu.dma_semaphore, #tpu.memory_space<semaphore_mem>>
    tpu.wait_dma2 semaphore(%87 : memref<!tpu.dma_semaphore, #tpu.memory_space<semaphore_mem>>) src(%84 : memref<1x64xf32, #tpu.memory_space<any>>) dst(%85 : memref<1x64xf32, #tpu.memory_space<vmem>>)
    %c6_i32_63 = arith.constant 6 : i32
    %c0_i32_64 = arith.constant 0 : i32
    %88 = tpu.memref_slice %arg3[%51, %c0_i32_64] : memref<32x64xf32, #tpu.memory_space<any>> -> memref<1x64xf32, #tpu.memory_space<any>>
    %c6_i32_65 = arith.constant 6 : i32
    %c0_i32_66 = arith.constant 0 : i32
    %89 = tpu.memref_slice %arg5[%c6_i32_65, %c0_i32_66] : memref<8x64xf32, #tpu.memory_space<vmem>> -> memref<1x64xf32, #tpu.memory_space<vmem>>
    %90 = tpu.memref_slice %arg6[%c6_i32_63] : memref<8x!tpu.dma_semaphore, #tpu.memory_space<semaphore_mem>> -> memref<1x!tpu.dma_semaphore, #tpu.memory_space<semaphore_mem>>
    %91 = tpu.memref_squeeze %90 : memref<1x!tpu.dma_semaphore, #tpu.memory_space<semaphore_mem>> -> memref<!tpu.dma_semaphore, #tpu.memory_space<semaphore_mem>>
    tpu.wait_dma2 semaphore(%91 : memref<!tpu.dma_semaphore, #tpu.memory_space<semaphore_mem>>) src(%88 : memref<1x64xf32, #tpu.memory_space<any>>) dst(%89 : memref<1x64xf32, #tpu.memory_space<vmem>>)
    %c7_i32_67 = arith.constant 7 : i32
    %c0_i32_68 = arith.constant 0 : i32
    %92 = tpu.memref_slice %arg3[%59, %c0_i32_68] : memref<32x64xf32, #tpu.memory_space<any>> -> memref<1x64xf32, #tpu.memory_space<any>>
    %c7_i32_69 = arith.constant 7 : i32
    %c0_i32_70 = arith.constant 0 : i32
    %93 = tpu.memref_slice %arg5[%c7_i32_69, %c0_i32_70] : memref<8x64xf32, #tpu.memory_space<vmem>> -> memref<1x64xf32, #tpu.memory_space<vmem>>
    %94 = tpu.memref_slice %arg6[%c7_i32_67] : memref<8x!tpu.dma_semaphore, #tpu.memory_space<semaphore_mem>> -> memref<1x!tpu.dma_semaphore, #tpu.memory_space<semaphore_mem>>
    %95 = tpu.memref_squeeze %94 : memref<1x!tpu.dma_semaphore, #tpu.memory_space<semaphore_mem>> -> memref<!tpu.dma_semaphore, #tpu.memory_space<semaphore_mem>>
    tpu.wait_dma2 semaphore(%95 : memref<!tpu.dma_semaphore, #tpu.memory_space<semaphore_mem>>) src(%92 : memref<1x64xf32, #tpu.memory_space<any>>) dst(%93 : memref<1x64xf32, #tpu.memory_space<vmem>>)
    %c0 = arith.constant 0 : index
    %c0_71 = arith.constant 0 : index
    %96 = vector.load %arg2[%c0, %c0_71] : memref<8x64xf32, #tpu.memory_space<vmem>>, vector<8x64xf32>
    %c0_72 = arith.constant 0 : index
    %c0_73 = arith.constant 0 : index
    %97 = vector.load %arg5[%c0_72, %c0_73] : memref<8x64xf32, #tpu.memory_space<vmem>>, vector<8x64xf32>
    %98 = arith.mulf %96, %96 : vector<8x64xf32>
    %cst = arith.constant dense<0.000000e+00> : vector<8xf32>
    %99 = vector.multi_reduction <add>, %98, %cst [1] : vector<8x64xf32> to vector<8xf32>
    %100 = vector.shape_cast %99 : vector<8xf32> to vector<8x1xf32>
    %101 = arith.mulf %97, %97 : vector<8x64xf32>
    %cst_74 = arith.constant dense<0.000000e+00> : vector<8xf32>
    %102 = vector.multi_reduction <add>, %101, %cst_74 [1] : vector<8x64xf32> to vector<8xf32>
    %103 = vector.shape_cast %102 : vector<8xf32> to vector<8x1xf32>
    %104 = arith.mulf %96, %97 : vector<8x64xf32>
    %cst_75 = arith.constant dense<0.000000e+00> : vector<8xf32>
    %105 = vector.multi_reduction <add>, %104, %cst_75 [1] : vector<8x64xf32> to vector<8xf32>
    %106 = vector.shape_cast %105 : vector<8xf32> to vector<8x1xf32>
    %107 = arith.addf %100, %103 : vector<8x1xf32>
    %cst_76 = arith.constant 2.000000e+00 : f32
    %108 = vector.broadcast %cst_76 : f32 to vector<8x1xf32>
    %109 = arith.mulf %108, %106 : vector<8x1xf32>
    %110 = arith.subf %107, %109 : vector<8x1xf32>
    %cst_77 = arith.constant 9.99999996E-13 : f32
    %cst_78 = arith.constant 9.99999995E+11 : f32
    %111 = vector.broadcast %cst_77 : f32 to vector<8x1xf32>
    %112 = arith.maximumf %111, %110 : vector<8x1xf32>
    %113 = vector.broadcast %cst_78 : f32 to vector<8x1xf32>
    %114 = arith.minimumf %113, %112 : vector<8x1xf32>
    %c0_79 = arith.constant 0 : index
    %c0_80 = arith.constant 0 : index
    %115 = vector.load %arg4[%c0_79, %c0_80] : memref<8x1xf32, #tpu.memory_space<vmem>>, vector<8x1xf32>
    tpu.vector_store %arg4[%c0_79, %c0_80], %114 {strides = array<i32>} : memref<8x1xf32, #tpu.memory_space<vmem>>, vector<8x1xf32>,
    return
  }
  func.func @transform_0(%arg0: i32, %arg1: memref<8xi32, #tpu.memory_space<smem>>) -> (i32, i32) {
    %c0_i32 = arith.constant 0 : i32
    %c0_i32_0 = arith.constant 0 : i32
    return %arg0, %c0_i32 : i32, i32
  }
  func.func @transform_2(%arg0: i32, %arg1: memref<8xi32, #tpu.memory_space<smem>>) -> (i32, i32) {
    %c0_i32 = arith.constant 0 : i32
    %c0_i32_0 = arith.constant 0 : i32
    return %arg0, %c0_i32 : i32, i32
  }
}

</mosaic_0001>

<bundles_post_ra>
// kernel: tpu_custom_call.1
= control target key start
LH: loop header
LB: loop body
LE: loop exit
PB: predicated region body
PF: predicated region fallthrough
CT: control target
= control target key end

     0   :  { %s532_s12 = smov [#allocation5]   ;;  %s702_s0 = inlined_call_operand.hbm [shape: s32[8], index: 0, kind: input, shape index: {}]   ;;  %s703_s1 = inlined_call_operand.hbm [shape: f32[8,64], index: 1, kind: input, shape index: {}]   ;;  %s704_s2 = inlined_call_operand.hbm [shape: f32[32,64], index: 2, kind: input, shape index: {}]   ;;  %s705_s3 = inlined_call_operand.vmem [shape: f32[8,1], index: 3, kind: output, shape index: {}]  }
   0x1   :  { %9 = dma.hbm_to_smem %s702_s0, 16, %s532_s12, [#allocation4] }
   0x2   :  { %512 = dma.done.wait [#allocation4], 16 }
   0x3   :  { %513 = vsyncadd [#allocation4], 4294967280 }
   0x4   :  { %11 = sfence }
   0x5   :  { %12 = vsyncpa [#allocation7], 0  ;;  %s533_s15 = smov [#allocation6]  }
   0x6   :  { %s19_s16 = sshll.u32 %s533_s15, 4  ;;  %s20_s16 = int_to_ptr.vmem [resolvable:$true] %s19_s16 }
   0x7   :  { %s324_s17 = scalar_lea.vmem %s20_s16, 128  ;;  %p329_p1 = scmp.lt.s32.totalorder %s20_s16, %s20_s16 }
   0x8   :  { %p325_p0 = scmp.ne.s32.totalorder %s20_s16, %s324_s17  ;;  %p330_p2 = scmp.lt.s32.totalorder %s324_s17, %s324_s17 }
   0xa   :  { %p331_p3 = por %p330_p2, %p329_p1 }
   0xc   :  { %p332_p4 = pnand %p331_p3, %p325_p0 }
   0xe   :  { %335 = shalt.err (!%p332_p4)
}
   0xf   :  { %22 = dma.hbm_to_vmem [thread:$0]  %s703_s1, 128, %s20_s16, [#allocation7]  }
  0x10   :  { %514 = dma.done.wait [#allocation7], 128  }
  0x11   :  { %515 = vsyncadd [#allocation7], 4294967168  ;;  %s27_s0 = sld [smem:[#allocation5]]  ;;  %s534_s20 = smov [#allocation2]  }
  0x12   :  { %s37_s21 = sshll.u32 %s534_s20, 4  ;;  %s570_s22 = sld [smem:[#allocation5 + $0x1]]  ;;  %s568_s21 = int_to_ptr.vmem [resolvable:$true] %s37_s21 }
  0x13   :  { %s535_s23 = smov [#allocation2 + $0x1]   ;;  %s572_s25 = sld [smem:[#allocation5 + $0x2]] }
  0x14   :  { %s54_s24 = sshll.u32 %s535_s23, 4  ;;  %s536_s26 = smov [#allocation2 + $0x2]   ;;  %s574_s24 = int_to_ptr.vmem [resolvable:$true] %s54_s24 }
  0x15   :  { %s71_s27 = sshll.u32 %s536_s26, 4  ;;  %s576_s28 = sld [smem:[#allocation5 + $0x3]]  ;;  %s578_s27 = int_to_ptr.vmem [resolvable:$true] %s71_s27 }
  0x16   :  { %s537_s29 = smov [#allocation2 + $0x3]   ;;  %s589_s11 = scalar_lea.hbm %s704_s2, 512 }
  0x17   :  { %s275_s1 = sshll.u32 %s27_s0, 4  ;;  %s580_s30 = sshll.u32 %s537_s29, 4  ;;  %s89_s30 = int_to_ptr.vmem [resolvable:$true] %s580_s30 }
  0x18   :  { %s29_s6 = scalar_lea.hbm %s704_s2, %s275_s1  ;;  %s277_s7 = sshll.u32 %s570_s22, 4 }
  0x19   :  { %s336_s8 = scalar_lea.hbm %s29_s6, 16  ;;  %p339_p6 = scmp.lt.s32.totalorder %s29_s6, %s704_s2 }
  0x1a   :  { %p337_p5 = scmp.ne.s32.totalorder %s29_s6, %s336_s8  ;;  %p340_p7 = scmp.lt.s32.totalorder %s589_s11, %s336_s8 }
  0x1c   :  { %p341_p8 = por %p340_p7, %p339_p6 }
  0x1e   :  { %p342_p9 = pnand %p341_p8, %p337_p5 }
  0x20   :  { %345 = shalt.err (!%p342_p9)  }
  0x21   :  { %s346_s14 = scalar_lea.vmem %s568_s21, 16  ;;  %s598_s15 = scalar_lea.vmem %s568_s21, 128 }
  0x22   :  { %p347_p10 = scmp.ne.s32.totalorder %s568_s21, %s346_s14  ;;  %p351_p11 = scmp.lt.s32.totalorder %s568_s21, %s568_s21 }
  0x23   :  { %p352_p12 = scmp.lt.s32.totalorder %s598_s15, %s346_s14 }
  0x25   :  { %p353_p13 = por %p352_p12, %p351_p11 }
  0x27   :  { %p354_p0 = pnand %p353_p13, %p347_p10 }
  0x29   :  { %357 = shalt.err (!%p354_p0)  }
  0x2a   :  { %40 = dma.hbm_to_vmem [thread:$0]  %s29_s6, 16, %s568_s21, [#allocation3] }
  0x2b   :  { %s44_s18 = scalar_lea.hbm %s704_s2, %s277_s7  ;;  %s279_s19 = sshll.u32 %s572_s25, 4 }
  0x2c   :  { %s358_s0 = scalar_lea.hbm %s44_s18, 16  ;;  %p361_p2 = scmp.lt.s32.totalorder %s44_s18, %s704_s2 }
  0x2d   :  { %p359_p1 = scmp.ne.s32.totalorder %s44_s18, %s358_s0  ;;  %p362_p3 = scmp.lt.s32.totalorder %s589_s11, %s358_s0 }
  0x2f   :  { %p363_p4 = por %p362_p3, %p361_p2 }
  0x31   :  { %p364_p5 = pnand %p363_p4, %p359_p1 }
  0x33   :  { %367 = shalt.err (!%p364_p5)  }
  0x34   :  { %s368_s23 = scalar_lea.vmem %s574_s24, 16  ;;  %p373_p7 = scmp.lt.s32.totalorder %s574_s24, %s568_s21 }
  0x35   :  { %p369_p6 = scmp.ne.s32.totalorder %s574_s24, %s368_s23  ;;  %p374_p8 = scmp.lt.s32.totalorder %s598_s15, %s368_s23 }
  0x37   :  { %p375_p9 = por %p374_p8, %p373_p7 }
  0x39   :  { %p376_p10 = pnand %p375_p9, %p369_p6 }
  0x3b   :  { %379 = shalt.err (!%p376_p10)  }
  0x3c   :  { %57 = dma.hbm_to_vmem [thread:$0]  %s44_s18, 16, %s574_s24, [#allocation3 + $0x1] }
  0x3d   :  { %s61_s1 = scalar_lea.hbm %s704_s2, %s279_s19  ;;  %s281_s29 = sshll.u32 %s576_s28, 4 }
  0x3e   :  { %s380_s4 = scalar_lea.hbm %s61_s1, 16  ;;  %p383_p12 = scmp.lt.s32.totalorder %s61_s1, %s704_s2 }
  0x3f   :  { %p381_p11 = scmp.ne.s32.totalorder %s61_s1, %s380_s4  ;;  %p384_p13 = scmp.lt.s32.totalorder %s589_s11, %s380_s4 }
  0x41   :  { %p385_p0 = por %p384_p13, %p383_p12 }
  0x43   :  { %p386_p1 = pnand %p385_p0, %p381_p11 }
  0x45   :  { %389 = shalt.err (!%p386_p1)  }
  0x46   :  { %s390_s24 = scalar_lea.vmem %s578_s27, 16  ;;  %p395_p3 = scmp.lt.s32.totalorder %s578_s27, %s568_s21 }
  0x47   :  { %p391_p2 = scmp.ne.s32.totalorder %s578_s27, %s390_s24  ;;  %p396_p4 = scmp.lt.s32.totalorder %s598_s15, %s390_s24 }
  0x49   :  { %p397_p5 = por %p396_p4, %p395_p3 }
  0x4b   :  { %p398_p6 = pnand %p397_p5, %p391_p2 }
  0x4d   :  { %401 = shalt.err (!%p398_p6)  }
  0x4e   :  { %74 = dma.hbm_to_vmem [thread:$0]  %s61_s1, 16, %s578_s27, [#allocation3 + $0x2] }
  0x4f   :  { %s78_s8 = scalar_lea.hbm %s704_s2, %s281_s29 }
  0x50   :  { %s402_s9 = scalar_lea.hbm %s78_s8, 16  ;;  %p405_p8 = scmp.lt.s32.totalorder %s78_s8, %s704_s2 }
  0x51   :  { %p403_p7 = scmp.ne.s32.totalorder %s78_s8, %s402_s9  ;;  %p406_p9 = scmp.lt.s32.totalorder %s589_s11, %s402_s9 }
  0x53   :  { %p407_p10 = por %p406_p9, %p405_p8 }
  0x55   :  { %p408_p11 = pnand %p407_p10, %p403_p7 }
  0x57   :  { %411 = shalt.err (!%p408_p11)  }
  0x58   :  { %s412_s13 = scalar_lea.vmem %s89_s30, 16  ;;  %p417_p13 = scmp.lt.s32.totalorder %s89_s30, %s568_s21 }
  0x59   :  { %p413_p12 = scmp.ne.s32.totalorder %s89_s30, %s412_s13  ;;  %p418_p0 = scmp.lt.s32.totalorder %s598_s15, %s412_s13 }
  0x5b   :  { %p419_p1 = por %p418_p0, %p417_p13 }
  0x5d   :  { %p420_p2 = pnand %p419_p1, %p413_p12 }
  0x5f   :  { %423 = shalt.err (!%p420_p2)  }
  0x60   :  { %91 = dma.hbm_to_vmem [thread:$0]  %s78_s8, 16, %s89_s30, [#allocation3 + $0x3] }
  0x61   :  { %s282_s27 = sld [smem:[#allocation5 + $0x4]]  ;;  %s538_s14 = smov [#allocation2 + $0x4]  }
  0x62   :  { %s105_s16 = sshll.u32 %s538_s14, 4  ;;  %s642_s17 = sld [smem:[#allocation5 + $0x5]]  ;;  %s106_s16 = int_to_ptr.vmem [resolvable:$true] %s105_s16 }
  0x63   :  { %s539_s18 = smov [#allocation2 + $0x5]   ;;  %s644_s0 = sld [smem:[#allocation5 + $0x6]] }
  0x64   :  { %s122_s19 = sshll.u32 %s539_s18, 4  ;;  %s540_s20 = smov [#allocation2 + $0x6]   ;;  %s646_s19 = int_to_ptr.vmem [resolvable:$true] %s122_s19 }
  0x65   :  { %s139_s22 = sshll.u32 %s540_s20, 4  ;;  %s648_s23 = sld [smem:[#allocation5 + $0x7]]  ;;  %s650_s22 = int_to_ptr.vmem [resolvable:$true] %s139_s22 }
  0x67   :  { %s283_s25 = sshll.u32 %s282_s27, 4 }
  0x68   :  { %s95_s1 = scalar_lea.hbm %s704_s2, %s283_s25  ;;  %s285_s29 = sshll.u32 %s642_s17, 4 }
  0x69   :  { %s424_s4 = scalar_lea.hbm %s95_s1, 16  ;;  %p427_p4 = scmp.lt.s32.totalorder %s95_s1, %s704_s2 }
  0x6a   :  { %p425_p3 = scmp.ne.s32.totalorder %s95_s1, %s424_s4  ;;  %p428_p5 = scmp.lt.s32.totalorder %s589_s11, %s424_s4 }
  0x6c   :  { %p429_p6 = por %p428_p5, %p427_p4 }
  0x6e   :  { %p430_p7 = pnand %p429_p6, %p425_p3 }
  0x70   :  { %433 = shalt.err (!%p430_p7)  }
  0x71   :  { %s434_s24 = scalar_lea.vmem %s106_s16, 16  ;;  %p439_p9 = scmp.lt.s32.totalorder %s106_s16, %s568_s21 }
  0x72   :  { %p435_p8 = scmp.ne.s32.totalorder %s106_s16, %s434_s24  ;;  %p440_p10 = scmp.lt.s32.totalorder %s598_s15, %s434_s24 }
  0x74   :  { %p441_p11 = por %p440_p10, %p439_p9 }
  0x76   :  { %p442_p12 = pnand %p441_p11, %p435_p8 }
  0x78   :  { %445 = shalt.err (!%p442_p12)  }
  0x79   :  { %108 = dma.hbm_to_vmem [thread:$0]  %s95_s1, 16, %s106_s16, [#allocation3 + $0x4] }
  0x7a   :  { %s112_s8 = scalar_lea.hbm %s704_s2, %s285_s29  ;;  %s287_s9 = sshll.u32 %s644_s0, 4 }
  0x7b   :  { %s446_s10 = scalar_lea.hbm %s112_s8, 16  ;;  %p449_p0 = scmp.lt.s32.totalorder %s112_s8, %s704_s2 }
  0x7c   :  { %p447_p13 = scmp.ne.s32.totalorder %s112_s8, %s446_s10  ;;  %p450_p1 = scmp.lt.s32.totalorder %s589_s11, %s446_s10 }
  0x7e   :  { %p451_p2 = por %p450_p1, %p449_p0 }
  0x80   :  { %p452_p3 = pnand %p451_p2, %p447_p13 }
  0x82   :  { %455 = shalt.err (!%p452_p3)  }
  0x83   :  { %s456_s27 = scalar_lea.vmem %s646_s19, 16  ;;  %p461_p5 = scmp.lt.s32.totalorder %s646_s19, %s568_s21 }
  0x84   :  { %p457_p4 = scmp.ne.s32.totalorder %s646_s19, %s456_s27  ;;  %p462_p6 = scmp.lt.s32.totalorder %s598_s15, %s456_s27 }
  0x86   :  { %p463_p7 = por %p462_p6, %p461_p5 }
  0x88   :  { %p464_p8 = pnand %p463_p7, %p457_p4 }
  0x8a   :  { %467 = shalt.err (!%p464_p8)  }
  0x8b   :  { %125 = dma.hbm_to_vmem [thread:$0]  %s112_s8, 16, %s646_s19, [#allocation3 + $0x5] }
  0x8c   :  { %s129_s17 = scalar_lea.hbm %s704_s2, %s287_s9  ;;  %s289_s18 = sshll.u32 %s648_s23, 4 }
  0x8d   :  { %s468_s0 = scalar_lea.hbm %s129_s17, 16  ;;  %p471_p10 = scmp.lt.s32.totalorder %s129_s17, %s704_s2 }
  0x8e   :  { %p469_p9 = scmp.ne.s32.totalorder %s129_s17, %s468_s0  ;;  %p472_p11 = scmp.lt.s32.totalorder %s589_s11, %s468_s0 }
  0x90   :  { %p473_p12 = por %p472_p11, %p471_p10 }
  0x92   :  { %p474_p13 = pnand %p473_p12, %p469_p9 }
  0x94   :  { %477 = shalt.err (!%p474_p13)  }
  0x95   :  { %s478_s19 = scalar_lea.vmem %s650_s22, 16  ;;  %p483_p1 = scmp.lt.s32.totalorder %s650_s22, %s568_s21 }
  0x96   :  { %p479_p0 = scmp.ne.s32.totalorder %s650_s22, %s478_s19  ;;  %p484_p2 = scmp.lt.s32.totalorder %s598_s15, %s478_s19 }
  0x98   :  { %p485_p3 = por %p484_p2, %p483_p1 }
  0x9a   :  { %p486_p4 = pnand %p485_p3, %p479_p0 }
  0x9c   :  { %489 = shalt.err (!%p486_p4)  }
  0x9d   :  { %142 = dma.hbm_to_vmem [thread:$0]  %s129_s17, 16, %s650_s22, [#allocation3 + $0x6] }
  0x9e   :  { %s146_s26 = scalar_lea.hbm %s704_s2, %s289_s18  ;;  %s541_s1 = smov [#allocation2 + $0x7]  }
  0x9f   :  { %s156_s29 = sshll.u32 %s541_s1, 4  ;;  %s490_s4 = scalar_lea.hbm %s146_s26, 16  ;;  %s157_s29 = int_to_ptr.vmem [resolvable:$true] %s156_s29 }
  0xa0   :  { %p491_p5 = scmp.ne.s32.totalorder %s146_s26, %s490_s4  ;;  %p493_p6 = scmp.lt.s32.totalorder %s146_s26, %s704_s2 }
  0xa1   :  { %p494_p7 = scmp.lt.s32.totalorder %s589_s11, %s490_s4 }
  0xa3   :  { %p495_p8 = por %p494_p7, %p493_p6 }
  0xa5   :  { %p496_p9 = pnand %p495_p8, %p491_p5 }
  0xa7   :  { %499 = shalt.err (!%p496_p9)  }
  0xa8   :  { %s500_s24 = scalar_lea.vmem %s157_s29, 16  ;;  %p505_p11 = scmp.lt.s32.totalorder %s157_s29, %s568_s21 }
  0xa9   :  { %p501_p10 = scmp.ne.s32.totalorder %s157_s29, %s500_s24  ;;  %p506_p12 = scmp.lt.s32.totalorder %s598_s15, %s500_s24 }
  0xab   :  { %p507_p13 = por %p506_p12, %p505_p11 }
  0xad   :  { %p508_p0 = pnand %p507_p13, %p501_p10 }
  0xaf   :  { %511 = shalt.err (!%p508_p0)  }
  0xb0   :  { %159 = dma.hbm_to_vmem [thread:$0]  %s146_s26, 16, %s157_s29, [#allocation3 + $0x7] }
  0xb1   :  { %516 = dma.done.wait [#allocation3], 16 }
  0xb2   :  { %517 = vsyncadd [#allocation3], 4294967280 }
  0xb3   :  { %518 = dma.done.wait [#allocation3 + $0x1], 16 }
  0xb4   :  { %519 = vsyncadd [#allocation3 + $0x1], 4294967280 }
  0xb5   :  { %520 = dma.done.wait [#allocation3 + $0x2], 16 }
  0xb6   :  { %521 = vsyncadd [#allocation3 + $0x2], 4294967280 }
  0xb7   :  { %522 = dma.done.wait [#allocation3 + $0x3], 16 }
  0xb8   :  { %523 = vsyncadd [#allocation3 + $0x3], 4294967280 }
  0xb9   :  { %524 = dma.done.wait [#allocation3 + $0x4], 16 }
  0xba   :  { %525 = vsyncadd [#allocation3 + $0x4], 4294967280 }
  0xbb   :  { %526 = dma.done.wait [#allocation3 + $0x5], 16 }
  0xbc   :  { %527 = vsyncadd [#allocation3 + $0x5], 4294967280 }
  0xbd   :  { %528 = dma.done.wait [#allocation3 + $0x6], 16 }
  0xbe   :  { %529 = vsyncadd [#allocation3 + $0x6], 4294967280 }
  0xbf   :  { %530 = dma.done.wait [#allocation3 + $0x7], 16 }
  0xc0   :  { %531 = vsyncadd [#allocation3 + $0x7], 4294967280  ;;  %v177_v0 = vld [vmem:[#allocation6] sm:$0xff]  ;;  %vm180_vm0 = vcmask 523264   ;;  %v178_v1 = vld [vmem:[#allocation2] sm:$0xff]  ;;  %vm197_vm1 = vcmask 7168  }
  0xc1   :  { %v179_v2 = vmul.f32 %v177_v0, %v177_v0  ;;  %v188_v3 = vmul.f32 %v178_v1, %v177_v0  ;;  %v184_v4 = vmul.f32 %v178_v1, %v178_v1 }
  0xc3   :  { %v181_v5 = vsel %vm180_vm0, %v179_v2, 0.0  ;;  %v189_v6 = vsel %vm180_vm0, %v188_v3, 0.0  ;;  %v185_v7 = vsel %vm180_vm0, %v184_v4, 0.0 }
  0xc4   :  { %182 = vadd.xlane.f32.xlu0 %v181_v5  ;;  %190 = vadd.xlane.f32.xlu1 %v189_v6 }
  0xc8   :  { %186 = vadd.xlane.f32.xlu0 %v185_v7 }
 0x14d   :  { %v183_v8 = vpop.xlane.xlu0 %182  ;;  %v191_v9 = vpop.xlane.xlu1 %190 }
 0x14e   :  { %v193_v10 = vmul.f32 2.0, %v191_v9 }
 0x151   :  { %v187_v11 = vpop.xlane.xlu0 %186 }
 0x152   :  { %v192_v12 = vadd.f32 %v187_v11, %v183_v8 }
 0x154   :  { %v194_v13 = vsub.f32 %v192_v12, %v193_v10 }
 0x156   :  { %v195_v14 = vmax.f32 %v194_v13, 1e-12 }
 0x158   :  { %v196_v15 = vmin.f32 %v195_v14, 1e+12 }
 0x15a   :  { %198 = vst.msk [vmem:[%s705_s3] sm:$0xff] %vm197_vm1, %v196_v15 }
 0x15b   :  { %203 = vsyncpa [#allocation7], 1 }
 0x15c   :  { %204 = vsyncmov [#allocation3] }
 0x15f   :  { %s205_s11 = vpop.sfrf %204 }
 0x160   :  { %p290_p1 = scmp.ne.s32.totalorder %s205_s11, 0 }
 0x162   :  { %209 = shalt.err (%p290_p1)  }
 0x163   :  { %211 = vsyncmov [#allocation3 + $0x1] }
 0x166   :  { %s212_s15 = vpop.sfrf %211 }
 0x167   :  { %p291_p2 = scmp.ne.s32.totalorder %s212_s15, 0 }
 0x169   :  { %216 = shalt.err (%p291_p2)  }
 0x16a   :  { %218 = vsyncmov [#allocation3 + $0x2] }
 0x16d   :  { %s219_s22 = vpop.sfrf %218 }
 0x16e   :  { %p292_p3 = scmp.ne.s32.totalorder %s219_s22, 0 }
 0x170   :  { %223 = shalt.err (%p292_p3)  }
 0x171   :  { %225 = vsyncmov [#allocation3 + $0x3] }
 0x174   :  { %s226_s28 = vpop.sfrf %225 }
 0x175   :  { %p293_p4 = scmp.ne.s32.totalorder %s226_s28, 0 }
 0x177   :  { %230 = shalt.err (%p293_p4)  }
 0x178   :  { %232 = vsyncmov [#allocation3 + $0x4] }
 0x17b   :  { %s233_s7 = vpop.sfrf %232 }
 0x17c   :  { %p294_p5 = scmp.ne.s32.totalorder %s233_s7, 0 }
 0x17e   :  { %237 = shalt.err (%p294_p5)  }
 0x17f   :  { %239 = vsyncmov [#allocation3 + $0x5] }
 0x182   :  { %s240_s3 = vpop.sfrf %239 }
 0x183   :  { %p295_p6 = scmp.ne.s32.totalorder %s240_s3, 0 }
 0x185   :  { %244 = shalt.err (%p295_p6)  }
 0x186   :  { %246 = vsyncmov [#allocation3 + $0x6] }
 0x189   :  { %s247_s8 = vpop.sfrf %246 }
 0x18a   :  { %p296_p7 = scmp.ne.s32.totalorder %s247_s8, 0 }
 0x18c   :  { %251 = shalt.err (%p296_p7)  }
 0x18d   :  { %253 = vsyncmov [#allocation3 + $0x7] }
 0x190   :  { %s254_s9 = vpop.sfrf %253 }
 0x191   :  { %p297_p8 = scmp.ne.s32.totalorder %s254_s9, 0 }
 0x193   :  { %258 = shalt.err (%p297_p8)  }

</bundles_post_ra>
